<compile_context>
chip_gen: v5e
topology: v5e:2x2
jax: 0.10.0
libtpu: 0.0.40
codegen_flags: <defaults>
</compile_context>

<pallas_src>
import functools

import jax
import jax.numpy as jnp
from jax.experimental import pallas as pl
from jax.experimental.pallas import tpu as pltpu


# ----------------------------------------------------------------------------- kernel
def _flipout_kernel(x_ref, insign_ref, wmean_ref, wpert_ref, outsign_ref,
                    bias_ref, out_ref, *scratch, n_k):
    """Computes one (tm, tn) output tile; K is reduced over grid axis 2 (innermost)."""
    x = x_ref[...]                                        # bf16 (tm, tk)
    s = insign_ref[...].astype(jnp.float32)               # int8 -> f32, values +/-1
    sx = (x * s).astype(x.dtype)                          # exact sign flip in bf16

    contrib = jnp.dot(x, wmean_ref[...], preferred_element_type=jnp.float32)
    # out_sign is constant over K, so applying it per K step and summing is exact.
    contrib = contrib + (
        jnp.dot(sx, wpert_ref[...], preferred_element_type=jnp.float32)
        * outsign_ref[...].astype(jnp.float32))

    if n_k == 1:
        # Single K step: write straight through, skip the accumulator round-trip.
        out_ref[...] = (contrib + bias_ref[...]).astype(out_ref.dtype)
    else:
        acc_ref = scratch[0]
        k = pl.program_id(2)

        @pl.when(k == 0)
        def _():
            acc_ref[...] = contrib                        # overwrite: no zero-init pass

        if n_k > 2:
            @pl.when((k > 0) & (k < n_k - 1))
            def _():
                acc_ref[...] += contrib

        @pl.when(k == n_k - 1)
        def _():
            out_ref[...] = (acc_ref[...] + contrib + bias_ref[...]).astype(out_ref.dtype)


# ----------------------------------------------------------------------------- tiling helpers
def _round_up(a, b):
    return (a + b - 1) // b * b


def _largest_divisor_tile(padded, unit, max_tile):
    """Largest multiple of `unit` that divides `padded` and is <= max_tile."""
    best, t = unit, unit
    while t <= min(max_tile, padded):
        if padded % t == 0:
            best = t
        t += unit
    return best


def _pick_m(B, tm_max):
    Bp = _round_up(B, 8)
    if Bp <= tm_max:
        return Bp, Bp                       # one full-height tile (legal for all dtypes)
    Bp = _round_up(B, 32)                   # int8 in_sign wants sublane multiples of 32
    return _largest_divisor_tile(Bp, 32, tm_max), Bp


def _pick_k(K, tk_max, max_waste=0.10):
    """Pick (tk, Kp) minimizing K steps, allowing <=10% extra zero padding of K."""
    base = _round_up(K, 128)
    best = None
    for extra in range(8):
        Kp = base + extra * 128
        if extra and (Kp - K) / Kp > max_waste:
            break
        tk = _largest_divisor_tile(Kp, 128, tk_max)
        cand = (Kp // tk, Kp, tk)           # fewest K steps, then least padding
        if best is None or cand < best:
            best = cand
    return best[2], best[1]


# ----------------------------------------------------------------------------- wrapper
@functools.partial(jax.jit, static_argnames=("tm_max", "tn_max", "tk_max"))
def linear_flipout_forward(x, weight_mean, weight_logvar, weight_noise,
                           in_sign, out_sign, bias_mean, bias_logvar, bias_noise,
                           *, tm_max=128, tn_max=512, tk_max=1024):
    B, K = x.shape
    N = weight_mean.shape[1]

    tm, Bp = _pick_m(B, tm_max)
    tk, Kp = _pick_k(K, tk_max)
    Np = _round_up(N, 128)
    tn = _largest_divisor_tile(Np, 128, tn_max)
    # v7x has 2 TensorCores: expose >=2 "parallel" (M, N) tiles when possible,
    # splitting N rather than shrinking the batch tile.
    if (Bp // tm) * (Np // tn) < 2 and Np >= 256:
        tn = _largest_divisor_tile(Np, 128, Np // 2)

    grid_m, grid_n, grid_k = Bp // tm, Np // tn, Kp // tk

    # Elementwise prologue in f32 (fused by XLA); only narrow streams hit the kernel.
    w_pert = weight_noise * weight_mean * jnp.exp(weight_logvar * 0.5)
    bias_eff = ((1.0 + bias_noise * jnp.exp(bias_logvar * 0.5))
                * bias_mean).reshape(1, -1).astype(jnp.float32)

    def pad2(a, r, c):
        return jnp.pad(a, ((0, r - a.shape[0]), (0, c - a.shape[1])))

    # Cast BEFORE padding so jnp.pad copies the narrow representation.
    x_p  = pad2(x.astype(jnp.bfloat16), Bp, Kp)
    is_p = pad2(in_sign.astype(jnp.int8), Bp, Kp)           # +/-1 -> 1 byte/elem
    wm_p = pad2(weight_mean.astype(jnp.bfloat16), Kp, Np)
    wp_p = pad2(w_pert.astype(jnp.bfloat16), Kp, Np)
    os_p = pad2(out_sign.astype(jnp.bfloat16), Bp, Np)      # +/-1 exact in bf16
    b_p  = pad2(bias_eff, 1, Np)

    flops = 4 * Bp * Kp * Np                                 # two matmuls, 2 flops/MAC
    bytes_accessed = (x_p.size * 2 + is_p.size + wm_p.size * 2 + wp_p.size * 2
                      + os_p.size * 2 + b_p.size * 4 + Bp * Np * 4)

    kernel = functools.partial(_flipout_kernel, n_k=grid_k)
    scratch = [pltpu.VMEM((tm, tn), jnp.float32)] if grid_k > 1 else []

    out = pl.pallas_call(
        kernel,
        out_shape=jax.ShapeDtypeStruct((Bp, Np), jnp.float32),
        grid_spec=pltpu.PrefetchScalarGridSpec(
            num_scalar_prefetch=0,
            grid=(grid_m, grid_n, grid_k),
            in_specs=[
                pl.BlockSpec((tm, tk), lambda i, j, k: (i, k)),   # x          bf16
                pl.BlockSpec((tm, tk), lambda i, j, k: (i, k)),   # in_sign    int8
                pl.BlockSpec((tk, tn), lambda i, j, k: (k, j)),   # W_mean     bf16
                pl.BlockSpec((tk, tn), lambda i, j, k: (k, j)),   # W_pert     bf16
                pl.BlockSpec((tm, tn), lambda i, j, k: (i, j)),   # out_sign   bf16
                pl.BlockSpec((1, tn),  lambda i, j, k: (0, j)),   # eff. bias  f32
            ],
            out_specs=pl.BlockSpec((tm, tn), lambda i, j, k: (i, j)),
            scratch_shapes=scratch,
        ),
        compiler_params=pltpu.CompilerParams(
            dimension_semantics=("parallel", "parallel", "arbitrary")),
        cost_estimate=pl.CostEstimate(
            flops=flops, transcendentals=0, bytes_accessed=bytes_accessed),
    )(x_p, is_p, wm_p, wp_p, os_p, b_p)

    return out[:B, :N]


# ----------------------------------------------------------------------------- reference
def reference_forward(x, weight_mean, weight_logvar, weight_noise,
                      in_sign, out_sign, bias_mean, bias_logvar, bias_noise):
    # Pure-JAX mirror of the PyTorch forward.  Matmul operands are cast to bf16
    # (f32 accumulation) — the same deliberate precision choice the kernel makes.
    w_pert = weight_noise * weight_mean * jnp.exp(weight_logvar * 0.5)
    mean = jnp.dot(x.astype(jnp.bfloat16), weight_mean.astype(jnp.bfloat16),
                   preferred_element_type=jnp.float32)
    pert = jnp.dot((in_sign * x).astype(jnp.bfloat16), w_pert.astype(jnp.bfloat16),
                   preferred_element_type=jnp.float32)
    bias = (1.0 + bias_noise * jnp.exp(bias_logvar * 0.5)) * bias_mean
    return mean + pert * out_sign + bias


# ----------------------------------------------------------------------------- harness
def _make_inputs(key, B, in_f, out_f):
    ks = jax.random.split(key, 9)
    # Parameters (shapes as in __init__; non-trivial values so the exp(logvar/2)
    # and bias terms are actually exercised, as they would be after training).
    weight_mean = jax.random.normal(ks[0], (in_f, out_f), jnp.float32) / out_f
    weight_logvar = -2.0 + 0.1 * jax.random.normal(ks[1], (in_f, out_f), jnp.float32)
    bias_mean = 0.1 * jax.random.normal(ks[2], (1, out_f), jnp.float32)
    bias_logvar = -2.0 + 0.1 * jax.random.normal(ks[3], (1, out_f), jnp.float32)
    # Input and the per-forward noise the torch module samples inside forward().
    x = jax.random.normal(ks[4], (B, in_f), jnp.float32)
    weight_noise = jax.random.normal(ks[5], (in_f, out_f), jnp.float32)
    in_sign = jnp.where(jax.random.uniform(ks[6], (B, in_f)) < 0.5, -1.0, 1.0
                        ).astype(jnp.float32)     # true Rademacher (+/-1, never 0)
    out_sign = jnp.where(jax.random.uniform(ks[7], (B, out_f)) < 0.5, -1.0, 1.0
                         ).astype(jnp.float32)
    bias_noise = jax.random.normal(ks[8], (1, out_f), jnp.float32)
    return (x, weight_mean, weight_logvar, weight_noise, in_sign, out_sign,
            bias_mean, bias_logvar, bias_noise)


if __name__ == "__main__":
    key = jax.random.PRNGKey(0)
    k_small, k_big = jax.random.split(key)

    # TODO(synk): cal_kld branch (scalar KL penalty) not implemented; module default is cal_kld=False.

    # Case 1: small module-like shapes — single-tile grid (1,1,1), n_k==1 direct-write path.
    args_small = _make_inputs(k_small, B=8, in_f=32, out_f=32)
    out_small = jax.block_until_ready(linear_flipout_forward(*args_small))
    ref_small = reference_forward(*args_small)
    assert out_small.shape == (8, 32)
    assert jnp.allclose(out_small, ref_small, atol=2e-3, rtol=2e-3), (
        float(jnp.max(jnp.abs(out_small - ref_small))))

    # Case 2: multi-tile shapes — grid (2, 1, 2): megacore-parallel M axis and a real
    # K reduction through the f32 accumulator (tm=128, tn=384, tk=768).
    args_big = _make_inputs(k_big, B=256, in_f=1536, out_f=384)
    out_big = jax.block_until_ready(linear_flipout_forward(*args_big))
    ref_big = reference_forward(*args_big)
    assert out_big.shape == (256, 384)
    assert jnp.allclose(out_big, ref_big, atol=5e-3, rtol=5e-3), (
        float(jnp.max(jnp.abs(out_big - ref_big))))

    print("KERNEL_OK")
</pallas_src>

<mosaic_0001>
module attributes {stable_mosaic.version = 11 : i64} {
  func.func @_flipout_kernel(%arg0: i32, %arg1: i32, %arg2: i32, %arg3: memref<8x128xbf16, #tpu.memory_space<vmem>>, %arg4: memref<8x128xi8, #tpu.memory_space<vmem>>, %arg5: memref<128x128xbf16, #tpu.memory_space<vmem>>, %arg6: memref<128x128xbf16, #tpu.memory_space<vmem>>, %arg7: memref<8x128xbf16, #tpu.memory_space<vmem>>, %arg8: memref<1x128xf32, #tpu.memory_space<vmem>>, %arg9: memref<8x128xf32, #tpu.memory_space<vmem>>) attributes {dimension_semantics = [#tpu.dimension_semantics<parallel>, #tpu.dimension_semantics<parallel>, #tpu.dimension_semantics<arbitrary>], iteration_bounds = array<i64: 1, 1, 1>, scalar_prefetch = 0 : i64, scratch_operands = 0 : i64, tpu.core_type = #tpu.core_type<tc>, window_params = [{transform_indices = @transform_0, window_bounds = array<i64: 8, 128>}, {transform_indices = @transform_1, window_bounds = array<i64: 8, 128>}, {transform_indices = @transform_2, window_bounds = array<i64: 128, 128>}, {transform_indices = @transform_3, window_bounds = array<i64: 128, 128>}, {transform_indices = @transform_4, window_bounds = array<i64: 8, 128>}, {transform_indices = @transform_5, window_bounds = array<i64: 1, 128>}, {transform_indices = @transform_6, window_bounds = array<i64: 8, 128>}]} {
    %c0 = arith.constant 0 : index
    %c0_0 = arith.constant 0 : index
    %0 = vector.load %arg3[%c0, %c0_0] : memref<8x128xbf16, #tpu.memory_space<vmem>>, vector<8x128xbf16>
    %c0_1 = arith.constant 0 : index
    %c0_2 = arith.constant 0 : index
    %1 = vector.load %arg4[%c0_1, %c0_2] : memref<8x128xi8, #tpu.memory_space<vmem>>, vector<8x128xi8>
    %2 = arith.sitofp %1 : vector<8x128xi8> to vector<8x128xf32>
    %3 = arith.extf %0 : vector<8x128xbf16> to vector<8x128xf32>
    %4 = arith.mulf %3, %2 : vector<8x128xf32>
    %5 = arith.truncf %4 : vector<8x128xf32> to vector<8x128xbf16>
    %c0_3 = arith.constant 0 : index
    %c0_4 = arith.constant 0 : index
    %6 = vector.load %arg5[%c0_3, %c0_4] : memref<128x128xbf16, #tpu.memory_space<vmem>>, vector<128x128xbf16>
    %cst = arith.constant dense<0.000000e+00> : vector<8x128xf32>
    %7 = tpu.matmul %0, %6, %cst {dimension_numbers = #tpu.dot_dimension_numbers<[1], [0], [0], [1], [0, 0, 1, 1], [], []>} : vector<8x128xbf16>, vector<128x128xbf16>, vector<8x128xf32> -> vector<8x128xf32>
    %c0_5 = arith.constant 0 : index
    %c0_6 = arith.constant 0 : index
    %8 = vector.load %arg6[%c0_5, %c0_6] : memref<128x128xbf16, #tpu.memory_space<vmem>>, vector<128x128xbf16>
    %cst_7 = arith.constant dense<0.000000e+00> : vector<8x128xf32>
    %9 = tpu.matmul %5, %8, %cst_7 {dimension_numbers = #tpu.dot_dimension_numbers<[1], [0], [0], [1], [0, 0, 1, 1], [], []>} : vector<8x128xbf16>, vector<128x128xbf16>, vector<8x128xf32> -> vector<8x128xf32>
    %c0_8 = arith.constant 0 : index
    %c0_9 = arith.constant 0 : index
    %10 = vector.load %arg7[%c0_8, %c0_9] : memref<8x128xbf16, #tpu.memory_space<vmem>>, vector<8x128xbf16>
    %11 = arith.extf %10 : vector<8x128xbf16> to vector<8x128xf32>
    %12 = arith.mulf %9, %11 : vector<8x128xf32>
    %13 = arith.addf %7, %12 : vector<8x128xf32>
    %c0_10 = arith.constant 0 : index
    %c0_11 = arith.constant 0 : index
    %14 = vector.load %arg8[%c0_10, %c0_11] : memref<1x128xf32, #tpu.memory_space<vmem>>, vector<1x128xf32>
    %15 = vector.broadcast %14 : vector<1x128xf32> to vector<8x128xf32>
    %16 = arith.addf %13, %15 : vector<8x128xf32>
    %c0_12 = arith.constant 0 : index
    %c0_13 = arith.constant 0 : index
    %17 = vector.load %arg9[%c0_12, %c0_13] : memref<8x128xf32, #tpu.memory_space<vmem>>, vector<8x128xf32>
    tpu.vector_store %arg9[%c0_12, %c0_13], %16 {strides = array<i32>} : memref<8x128xf32, #tpu.memory_space<vmem>>, vector<8x128xf32>,
    return
  }
  func.func @transform_0(%arg0: i32, %arg1: i32, %arg2: i32) -> (i32, i32) {
    %c0_i32 = arith.constant 0 : i32
    return %arg0, %arg2 : i32, i32
  }
  func.func @transform_1(%arg0: i32, %arg1: i32, %arg2: i32) -> (i32, i32) {
    %c0_i32 = arith.constant 0 : i32
    return %arg0, %arg2 : i32, i32
  }
  func.func @transform_2(%arg0: i32, %arg1: i32, %arg2: i32) -> (i32, i32) {
    %c0_i32 = arith.constant 0 : i32
    return %arg2, %arg1 : i32, i32
  }
  func.func @transform_3(%arg0: i32, %arg1: i32, %arg2: i32) -> (i32, i32) {
    %c0_i32 = arith.constant 0 : i32
    return %arg2, %arg1 : i32, i32
  }
  func.func @transform_4(%arg0: i32, %arg1: i32, %arg2: i32) -> (i32, i32) {
    %c0_i32 = arith.constant 0 : i32
    return %arg0, %arg1 : i32, i32
  }
  func.func @transform_5(%arg0: i32, %arg1: i32, %arg2: i32) -> (i32, i32) {
    %c0_i32 = arith.constant 0 : i32
    %c0_i32_0 = arith.constant 0 : i32
    return %c0_i32, %arg1 : i32, i32
  }
  func.func @transform_6(%arg0: i32, %arg1: i32, %arg2: i32) -> (i32, i32) {
    %c0_i32 = arith.constant 0 : i32
    return %arg0, %arg1 : i32, i32
  }
}

</mosaic_0001>

<bundles_post_ra>
// kernel: linear_flipout_forward.1
= control target key start
LH: loop header
LB: loop body
LE: loop exit
PB: predicated region body
PF: predicated region fallthrough
CT: control target
= control target key end

     0   :  { %s417_s0 = inlined_call_operand.vmem [shape: bf16[8,128], index: 0, kind: input, shape index: {}]   ;;  %s418_s1 = inlined_call_operand.vmem [shape: s8[8,128], index: 1, kind: input, shape index: {}]   ;;  %s419_s2 = inlined_call_operand.vmem [shape: bf16[128,128], index: 2, kind: input, shape index: {}]   ;;  %s420_s3 = inlined_call_operand.vmem [shape: bf16[128,128], index: 3, kind: input, shape index: {}]   ;;  %s421_s4 = inlined_call_operand.vmem [shape: bf16[8,128], index: 4, kind: input, shape index: {}]   ;;  %s422_s5 = inlined_call_operand.vmem [shape: f32[1,128], index: 5, kind: input, shape index: {}]   ;;  %s423_s6 = inlined_call_operand.hbm [shape: f32[8,128], index: 6, kind: output, shape index: {}]  }
   0x1   :  { %v289_v0 = vld [vmem:[%s420_s3 + $0x38] sm:$0xff]  ;;  %v288_v2 = vld [vmem:[%s420_s3 + $0x30] sm:$0xff]  ;;  %v287_v4 = vld [vmem:[%s420_s3 + $0x28] sm:$0xff] }
   0x2   :  { %v281_v1 = vld [vmem:[%s419_s2 + $0x38] sm:$0xff]  ;;  %111 = vmatpush.bf16.msra.mxu0 %v289_v0  ;;  %v280_v3 = vld [vmem:[%s419_s2 + $0x30] sm:$0xff]  ;;  %v279_v5 = vld [vmem:[%s419_s2 + $0x28] sm:$0xff] }
   0x3   :  { %175 = vmatpush.bf16.msra.mxu1 %v281_v1 }
   0x6   :  { %112 = vmatpush.bf16.msra.mxu0 %v288_v2 }
   0x7   :  { %176 = vmatpush.bf16.msra.mxu1 %v280_v3 }
   0x8   :  { %11 = vsyncpa [#allocation3], 0  ;;  %v286_v6 = vld [vmem:[%s420_s3 + $0x20] sm:$0xff]  ;;  %v285_v8 = vld [vmem:[%s420_s3 + $0x18] sm:$0xff]  ;;  %s201_s13 = sshll.u32 %s423_s6, 4  ;;  %s202_s13 = int_to_ptr.hbm [resolvable:$true] %s201_s13 }
   0x9   :  { %v278_v7 = vld [vmem:[%s419_s2 + $0x20] sm:$0xff]  ;;  %v277_v9 = vld [vmem:[%s419_s2 + $0x18] sm:$0xff]  ;;  %v284_v12 = vld [vmem:[%s420_s3 + $0x10] sm:$0xff] }
   0xa   :  { %113 = vmatpush.bf16.msra.mxu0 %v287_v4  ;;  %v25_v10 = vld [vmem:[%s418_s1] sm:$0x3]  ;;  %v276_v13 = vld [vmem:[%s419_s2 + $0x10] sm:$0xff]  ;;  %v283_v17 = vld [vmem:[%s420_s3 + $0x8] sm:$0xff] }
   0xb   :  { %177 = vmatpush.bf16.msra.mxu1 %v279_v5  ;;  %v26_v11 = vunpack.c.0.s8 %v25_v10  ;;  %v24_v14 = vld [vmem:[%s417_s0] sm:$0xf]  ;;  %v275_v18 = vld [vmem:[%s419_s2 + $0x8] sm:$0xff] }
   0xc   :  { %v28_v16 = vunpack.c.l.bf16 %v24_v14  ;;  %v282_v20 = vld [vmem:[%s420_s3] sm:$0xff]  ;;  %s318_s3 = smov [#allocation2]  }
   0xd   :  { %v27_v15 = vcvt.s32.f32 %v26_v11  ;;  %v274_v21 = vld [vmem:[%s419_s2] sm:$0xff]  ;;  %s199_s11 = sshll.u32 %s318_s3, 4  ;;  %s200_s11 = int_to_ptr.vmem [resolvable:$true] %s199_s11 }
   0xe   :  { %114 = vmatpush.bf16.msra.mxu0 %v286_v6  ;;  %v124_v23 = vld [vmem:[%s421_s4] sm:$0xf] }
   0xf   :  { %178 = vmatpush.bf16.msra.mxu1 %v278_v7  ;;  %v29_v19 = vmul.f32 %v28_v16, %v27_v15  ;;  %v125_v24 = vunpack.c.l.bf16 %v124_v23  ;;  %v291_v28 = vld [vmem:[%s422_s5] ss:$0 sm:$0xff] }
  0x11   :  { %v30_v22 = vpack.c.bf16 %v29_v19, %v29_v19 }
  0x12   :  { %115 = vmatpush.bf16.msra.mxu0 %v285_v8 }
  0x13   :  { %179 = vmatpush.bf16.msra.mxu1 %v277_v9 }
  0x16   :  { %116 = vmatpush.bf16.msra.mxu0 %v284_v12 }
  0x17   :  { %180 = vmatpush.bf16.msra.mxu1 %v276_v13 }
  0x1a   :  { %117 = vmatpush.bf16.msra.mxu0 %v283_v17 }
  0x1b   :  { %181 = vmatpush.bf16.msra.mxu1 %v275_v18 }
  0x1e   :  { %118 = vmatpush.bf16.msra.mxu0 %v282_v20 }
  0x1f   :  { %182 = vmatpush.bf16.msra.mxu1 %v274_v21 }
  0x21   :  { %119 = vmatmul.bf16.vlgmr.msra.gmra.mxu0 %v30_v22 }
  0x22   :  { %183 = vmatmul.bf16.vlgmr.msra.gmra.mxu1 %v24_v14 }
  0x9e   :  { %v120_v25 = vpop.f32.mrf.mxu0 }
  0x9f   :  { %v184_v26 = vpop.f32.mrf.mxu1  ;;  %v126_v27 = vmul.f32 %v125_v24, %v120_v25 }
  0xa1   :  { %v185_v29 = vadd.f32 %v184_v26, %v126_v27 }
  0xa3   :  { %v192_v30 = vadd.f32 %v291_v28, %v185_v29 }
  0xa5   :  { %193 = vst [vmem:[#allocation2] sm:$0xff] %v192_v30 }
  0xa6   :  { %v122_v31 = vpop.f32.mrf.mxu0  ;;  %204 = dma.vmem_to_hbm [thread:$0]  %s200_s11, 128, %s202_s13, [#allocation3]  }
  0xa7   :  { %v186_v32 = vpop.f32.mrf.mxu1 }
  0xa8   :  { %316 = dma.done.wait [#allocation3], 128  }
  0xa9   :  { %317 = vsyncadd [#allocation3], 4294967168 }
  0xaa   :  { %209 = vsyncpa [#allocation3], 1 }

</bundles_post_ra>
